<compile_context>
chip_gen: v7x
topology: tpu7x:2x2x1
jax: 0.10.0
libtpu: 0.0.40
codegen_flags: <defaults>
</compile_context>

<pallas_src>
import jax
import jax.numpy as jnp
from jax.experimental import pallas as pl
from jax.experimental.pallas import tpu as pltpu


def _round_up(x, m):
    return ((x + m - 1) // m) * m


def _astro_gate_kernel(x_ref, w_ref, b_ref, o_ref):
    # x_ref: (TM, P)   packed trace scalars (P original rows per packed row)
    # w_ref: (P, Hp)   block-diagonal expansion of the (1, H) weight row
    # b_ref: (1, Hp)   bias tiled P times along the lane axis
    # o_ref: (TM, Hp)  lane-dense output block (Hp == 128 when packing is on)
    x = x_ref[...].astype(jnp.float32)
    w = w_ref[...].astype(jnp.float32)
    b = b_ref[...].astype(jnp.float32)

    p_factor = w_ref.shape[0]            # static Python int
    # Unrolled sum of broadcast multiply-adds: (TM,1)*(1,Hp).  P is small
    # (128 // H); all on the VPU, which has huge slack in this HBM-bound
    # kernel.  The zeros in the block-diagonal w_exp select the right lane
    # group for each packed row.
    val = x[:, 0:1] * w[0:1, :]
    for p in range(1, p_factor):
        val = val + x[:, p:p + 1] * w[p:p + 1, :]

    o_ref[...] = (val + b).astype(o_ref.dtype)


def astro_feedback_gate(astro_trace, weight, bias, *, tm_target=512):
    """astro_trace: (B, S, 1); weight: (H, 1) [nn.Linear layout]; bias: (H,)."""
    B, S, K = astro_trace.shape
    assert K == 1
    H = weight.shape[0]
    M = B * S
    out_dtype = astro_trace.dtype

    # ---- lane packing factor -------------------------------------------------
    if H < 128 and 128 % H == 0:
        P = 128 // H            # fold P rows of M into the lane axis
    else:
        P = 1                   # H already lane-dense enough (or doesn't divide)
    Hp = P * H

    # ---- tiny resident parameter blocks -------------------------------------
    w_row = weight.reshape(1, H).astype(jnp.float32)              # (1, H)
    if P == 1:
        w_exp = w_row                                             # (1, H)
    else:
        eye = jnp.eye(P, dtype=jnp.float32)                       # (P, P)
        # w_exp[p, q*H + h] = (p == q) * w[h]
        w_exp = (eye[:, :, None] * w_row[None, :, :]).reshape(P, Hp)
    b_lane = jnp.tile(bias.reshape(1, H).astype(jnp.float32), (1, P))  # (1, Hp)

    # ---- tile size / padding -------------------------------------------------
    rows = (M + P - 1) // P                         # packed rows needed
    # Keep double-buffered output blocks <= ~16 MiB so the tile also fits
    # v7x's smaller (64 MiB physical / 32 MiB scoped) VMEM with headroom.
    per_buf_budget = 8 * 1024 * 1024
    tm_cap = max(8, (per_buf_budget // (2 * Hp * 4)) // 8 * 8)
    tm = min(tm_target, tm_cap, _round_up(rows, 8))
    tm = max(8, (tm // 8) * 8)                      # sublane multiple
    rows_padded = _round_up(rows, tm)
    m_padded = rows_padded * P

    # ---- pack the trace ------------------------------------------------------
    x_flat = astro_trace.reshape(M)
    if m_padded != M:
        x_flat = jnp.pad(x_flat, (0, m_padded - M))
    x_packed = x_flat.reshape(rows_padded, P)       # x_packed[m', p] = x[m'*P + p]

    grid = (rows_padded // tm,)

    out_packed = pl.pallas_call(
        _astro_gate_kernel,
        out_shape=jax.ShapeDtypeStruct((rows_padded, Hp), out_dtype),
        grid_spec=pltpu.PrefetchScalarGridSpec(
            num_scalar_prefetch=0,
            grid=grid,
            in_specs=[
                # streamed trace tiles
                pl.BlockSpec((tm, P), lambda i: (i, 0)),
                # resident params: constant index_map -> DMA'd once, reused
                pl.BlockSpec((P, Hp), lambda i: (0, 0)),
                pl.BlockSpec((1, Hp), lambda i: (0, 0)),
            ],
            out_specs=pl.BlockSpec((tm, Hp), lambda i: (i, 0)),
        ),
        compiler_params=pltpu.CompilerParams(
            # M tiles are independent -> shard across TensorCores on v7x.
            dimension_semantics=("parallel",),
            # Explicit scoped-VMEM limit (covers v5e's 16 MiB default) while
            # staying under v7x's 64 MiB physical VMEM.
            vmem_limit_bytes=64 * 1024 * 1024,
        ),
    )(x_packed, w_exp, b_lane)

    # Undo packing: (rows_padded, P*H) -> (m_padded, H) row-major, slice, reshape.
    out = out_packed.reshape(m_padded, H)[:M]
    return out.reshape(B, S, H)


if __name__ == "__main__":
    batch_size, seq_len, hidden_dim = 2, 8, 32

    key = jax.random.PRNGKey(0)
    k_x, k_w, k_b = jax.random.split(key, 3)

    # Deterministic parameter init mimicking nn.Linear(1, hidden_dim):
    # weight, bias ~ U(-1/sqrt(in_features), 1/sqrt(in_features)) = U(-1, 1).
    weight = jax.random.uniform(k_w, (hidden_dim, 1), jnp.float32, -1.0, 1.0)
    bias = jax.random.uniform(k_b, (hidden_dim,), jnp.float32, -1.0, 1.0)

    # astro_trace: (B, S, 1) — random data so the kernel is actually exercised.
    astro_trace = jax.random.normal(k_x, (batch_size, seq_len, 1), jnp.float32)

    out = astro_feedback_gate(astro_trace, weight, bias)
    out = jax.block_until_ready(out)

    # Reference check in plain JAX (same math as torch.nn.Linear).
    ref = astro_trace @ weight.T + bias  # (B, S, H)
    assert out.shape == (batch_size, seq_len, hidden_dim)
    assert jnp.allclose(out, ref, atol=1e-5, rtol=1e-5)

    print("KERNEL_OK")
</pallas_src>

<mosaic_0001>
module attributes {stable_mosaic.version = 11 : i64} {
  func.func @_astro_gate_kernel(%arg0: i32, %arg1: memref<8x4xf32, #tpu.memory_space<vmem>>, %arg2: memref<4x128xf32, #tpu.memory_space<vmem>>, %arg3: memref<1x128xf32, #tpu.memory_space<vmem>>, %arg4: memref<8x128xf32, #tpu.memory_space<vmem>>) attributes {dimension_semantics = [#tpu.dimension_semantics<parallel>], iteration_bounds = array<i64: 1>, scalar_prefetch = 0 : i64, scratch_operands = 0 : i64, tpu.core_type = #tpu.core_type<tc>, window_params = [{transform_indices = @transform_0, window_bounds = array<i64: 8, 4>}, {pipeline_mode = #tpu.pipeline_mode<synchronous>, transform_indices = @transform_1, window_bounds = array<i64: 4, 128>}, {pipeline_mode = #tpu.pipeline_mode<synchronous>, transform_indices = @transform_2, window_bounds = array<i64: 1, 128>}, {transform_indices = @transform_3, window_bounds = array<i64: 8, 128>}]} {
    %c0 = arith.constant 0 : index
    %c0_0 = arith.constant 0 : index
    %0 = vector.load %arg1[%c0, %c0_0] : memref<8x4xf32, #tpu.memory_space<vmem>>, vector<8x4xf32>
    %c0_1 = arith.constant 0 : index
    %c0_2 = arith.constant 0 : index
    %1 = vector.load %arg2[%c0_1, %c0_2] : memref<4x128xf32, #tpu.memory_space<vmem>>, vector<4x128xf32>
    %c0_3 = arith.constant 0 : index
    %c0_4 = arith.constant 0 : index
    %2 = vector.load %arg3[%c0_3, %c0_4] : memref<1x128xf32, #tpu.memory_space<vmem>>, vector<1x128xf32>
    %3 = vector.extract_strided_slice %0 {offsets = [0, 0], sizes = [8, 1], strides = [1, 1]} : vector<8x4xf32> to vector<8x1xf32>
    %4 = vector.extract_strided_slice %1 {offsets = [0, 0], sizes = [1, 128], strides = [1, 1]} : vector<4x128xf32> to vector<1x128xf32>
    %5 = vector.broadcast %3 : vector<8x1xf32> to vector<8x128xf32>
    %6 = vector.broadcast %4 : vector<1x128xf32> to vector<8x128xf32>
    %7 = arith.mulf %5, %6 : vector<8x128xf32>
    %8 = vector.extract_strided_slice %0 {offsets = [0, 1], sizes = [8, 1], strides = [1, 1]} : vector<8x4xf32> to vector<8x1xf32>
    %9 = vector.extract_strided_slice %1 {offsets = [1, 0], sizes = [1, 128], strides = [1, 1]} : vector<4x128xf32> to vector<1x128xf32>
    %10 = vector.broadcast %8 : vector<8x1xf32> to vector<8x128xf32>
    %11 = vector.broadcast %9 : vector<1x128xf32> to vector<8x128xf32>
    %12 = arith.mulf %10, %11 : vector<8x128xf32>
    %13 = arith.addf %7, %12 : vector<8x128xf32>
    %14 = vector.extract_strided_slice %0 {offsets = [0, 2], sizes = [8, 1], strides = [1, 1]} : vector<8x4xf32> to vector<8x1xf32>
    %15 = vector.extract_strided_slice %1 {offsets = [2, 0], sizes = [1, 128], strides = [1, 1]} : vector<4x128xf32> to vector<1x128xf32>
    %16 = vector.broadcast %14 : vector<8x1xf32> to vector<8x128xf32>
    %17 = vector.broadcast %15 : vector<1x128xf32> to vector<8x128xf32>
    %18 = arith.mulf %16, %17 : vector<8x128xf32>
    %19 = arith.addf %13, %18 : vector<8x128xf32>
    %20 = vector.extract_strided_slice %0 {offsets = [0, 3], sizes = [8, 1], strides = [1, 1]} : vector<8x4xf32> to vector<8x1xf32>
    %21 = vector.extract_strided_slice %1 {offsets = [3, 0], sizes = [1, 128], strides = [1, 1]} : vector<4x128xf32> to vector<1x128xf32>
    %22 = vector.broadcast %20 : vector<8x1xf32> to vector<8x128xf32>
    %23 = vector.broadcast %21 : vector<1x128xf32> to vector<8x128xf32>
    %24 = arith.mulf %22, %23 : vector<8x128xf32>
    %25 = arith.addf %19, %24 : vector<8x128xf32>
    %26 = vector.broadcast %2 : vector<1x128xf32> to vector<8x128xf32>
    %27 = arith.addf %25, %26 : vector<8x128xf32>
    %c0_5 = arith.constant 0 : index
    %c0_6 = arith.constant 0 : index
    %28 = vector.load %arg4[%c0_5, %c0_6] : memref<8x128xf32, #tpu.memory_space<vmem>>, vector<8x128xf32>
    tpu.vector_store %arg4[%c0_5, %c0_6], %27 {strides = array<i32>} : memref<8x128xf32, #tpu.memory_space<vmem>>, vector<8x128xf32>,
    return
  }
  func.func @transform_0(%arg0: i32) -> (i32, i32) {
    %c0_i32 = arith.constant 0 : i32
    %c0_i32_0 = arith.constant 0 : i32
    return %arg0, %c0_i32 : i32, i32
  }
  func.func @transform_1(%arg0: i32) -> (i32, i32) {
    %c0_i32 = arith.constant 0 : i32
    %c0_i32_0 = arith.constant 0 : i32
    %c0_i32_1 = arith.constant 0 : i32
    return %c0_i32, %c0_i32_0 : i32, i32
  }
  func.func @transform_2(%arg0: i32) -> (i32, i32) {
    %c0_i32 = arith.constant 0 : i32
    %c0_i32_0 = arith.constant 0 : i32
    %c0_i32_1 = arith.constant 0 : i32
    return %c0_i32, %c0_i32_0 : i32, i32
  }
  func.func @transform_3(%arg0: i32) -> (i32, i32) {
    %c0_i32 = arith.constant 0 : i32
    %c0_i32_0 = arith.constant 0 : i32
    return %arg0, %c0_i32 : i32, i32
  }
}

</mosaic_0001>

<bundles_post_ra>
// kernel: tpu_custom_call.1
= control target key start
LH: loop header
LB: loop body
LE: loop exit
PB: predicated region body
PF: predicated region fallthrough
CT: control target
= control target key end

     0   :  { %8 = vsyncpa [#allocation3], 0  ;;  %s301_s0 = inlined_call_operand.hbm [shape: f32[8,4], index: 0, kind: input, shape index: {}]   ;;  %s302_s1 = inlined_call_operand.hbm [shape: f32[4,128], index: 1, kind: input, shape index: {}]   ;;  %s303_s2 = inlined_call_operand.hbm [shape: f32[1,128], index: 2, kind: input, shape index: {}]   ;;  %s304_s3 = inlined_call_operand.hbm [shape: f32[8,128], index: 3, kind: output, shape index: {}]  }
   0x1   :  { %9 = vsyncpa [#allocation6], 0 }
   0x2   :  { %10 = vsyncpa [#allocation4], 0  ;;  %s225_s12 = smov [#allocation5]   ;;  %s226_s14 = smov [#allocation2]  }
   0x3   :  { %s27_s13 = sshll.u32 %s225_s12, 4  ;;  %s17_s15 = sshll.u32 %s226_s14, 4  ;;  %s28_s13 = int_to_ptr.vmem [resolvable:$true] %s27_s13  ;;  %s18_s15 = int_to_ptr.vmem [resolvable:$true] %s17_s15 }
   0x4   :  { %s131_s18 = scalar_lea.hbm %s302_s1, 64 }
   0x5   :  { %p132_p0 = scmp.ne.s32.totalorder %s302_s1, %s131_s18  ;;  %p135_p1 = scmp.lt.u32.totalorder %s131_s18, %s302_s1 }
   0x7   :  { %p137_p2 = pnand %p135_p1, %p132_p0 }
   0x9   :  { %140 = shalt.err (!%p137_p2)
}
   0xa   :  { %s141_s23 = scalar_lea.vmem %s28_s13, 64  ;;  %p146_p4 = scmp.lt.s32.totalorder %s28_s13, %s28_s13 }
   0xb   :  { %p142_p3 = scmp.ne.s32.totalorder %s28_s13, %s141_s23  ;;  %p147_p5 = scmp.lt.s32.totalorder %s141_s23, %s141_s23 }
   0xd   :  { %p148_p6 = por %p147_p5, %p146_p4 }
   0xf   :  { %p149_p7 = pnand %p148_p6, %p142_p3 }
  0x11   :  { %152 = shalt.err (!%p149_p7)
}
  0x12   :  { %30 = dma.hbm_to_vmem [thread:$0]  %s302_s1, 64, %s28_s13, [#allocation6]  }
  0x13   :  { %s153_s28 = scalar_lea.hbm %s301_s0, 128 }
  0x14   :  { %p154_p8 = scmp.ne.s32.totalorder %s301_s0, %s153_s28  ;;  %p157_p9 = scmp.lt.u32.totalorder %s153_s28, %s301_s0 }
  0x16   :  { %p159_p10 = pnand %p157_p9, %p154_p8 }
  0x18   :  { %162 = shalt.err (!%p159_p10)
}
  0x19   :  { %s163_s6 = scalar_lea.vmem %s18_s15, 128  ;;  %p168_p12 = scmp.lt.s32.totalorder %s18_s15, %s18_s15 }
  0x1a   :  { %p164_p11 = scmp.ne.s32.totalorder %s18_s15, %s163_s6  ;;  %p169_p13 = scmp.lt.s32.totalorder %s163_s6, %s163_s6 }
  0x1c   :  { %p170_p0 = por %p169_p13, %p168_p12 }
  0x1e   :  { %p171_p1 = pnand %p170_p0, %p164_p11 }
  0x20   :  { %174 = shalt.err (!%p171_p1)
}
  0x21   :  { %20 = dma.hbm_to_vmem [thread:$0]  %s301_s0, 128, %s18_s15, [#allocation3]  }
  0x22   :  { %s227_s8 = smov [#allocation7]   ;;  %s175_s12 = scalar_lea.hbm %s303_s2, 16 }
  0x23   :  { %s37_s9 = sshll.u32 %s227_s8, 4  ;;  %p176_p2 = scmp.ne.s32.totalorder %s303_s2, %s175_s12  ;;  %s38_s9 = int_to_ptr.vmem [resolvable:$true] %s37_s9 }
  0x24   :  { %p179_p3 = scmp.lt.u32.totalorder %s175_s12, %s303_s2 }
  0x26   :  { %p181_p4 = pnand %p179_p3, %p176_p2 }
  0x28   :  { %184 = shalt.err (!%p181_p4)
}
  0x29   :  { %s185_s18 = scalar_lea.vmem %s38_s9, 16  ;;  %s189_s0 = scalar_lea.vmem %s38_s9, 32 }
  0x2a   :  { %p186_p5 = scmp.ne.s32.totalorder %s38_s9, %s185_s18  ;;  %p190_p6 = scmp.lt.s32.totalorder %s38_s9, %s38_s9 }
  0x2b   :  { %p191_p7 = scmp.lt.s32.totalorder %s189_s0, %s185_s18 }
  0x2d   :  { %p192_p8 = por %p191_p7, %p190_p6 }
  0x2f   :  { %p193_p9 = pnand %p192_p8, %p186_p5 }
  0x31   :  { %196 = shalt.err (!%p193_p9)
}
  0x32   :  { %40 = dma.hbm_to_vmem [thread:$0]  %s303_s2, 16, %s38_s9, [#allocation6]  }
  0x33   :  { %219 = dma.done.wait [#allocation3], 128  }
  0x34   :  { %220 = vsyncadd [#allocation3], 4294967168 }
  0x35   :  { %221 = dma.done.wait [#allocation6], 80  }
  0x36   :  { %222 = vsyncadd [#allocation6], 4294967216  ;;  %v228_v0 = vmov 0   ;;  %v229_v1 = vmov 2   ;;  %v50_v2 = vld [vmem:[#allocation2] sm:$0xff]  ;;  %v230_v3 = vmov 1   ;;  %v58_v5 = vlaneseq }
  0x37   :  { %126 = vset.pattern.permute.xlu0 %v228_v0  ;;  %128 = vset.pattern.permute.xlu1 %v229_v1  ;;  %v231_v4 = vmov 3   ;;  %v51_v9 = vld [vmem:[#allocation5] sm:$0xf]  ;;  %v117_v26 = vld [vmem:[#allocation7] ss:$0 sm:$0xff]  ;;  %s232_s2 = smov [#allocation8]  }
  0x38   :  { %55 = vperm.xlu0 %126, %v50_v2   ;;  %74 = vperm.xlu1 %128, %v50_v2   ;;  %v59_v6 = vshrl.u32 %v58_v5, 7  ;;  %s107_s20 = sshll.u32 %s232_s2, 4  ;;  %s108_s20 = int_to_ptr.vmem [resolvable:$true] %s107_s20 }
  0x39   :  { %s197_s21 = scalar_lea.vmem %s108_s20, 128  ;;  %p202_p11 = scmp.lt.s32.totalorder %s108_s20, %s108_s20 }
  0x3a   :  { %v60_v7 = vsub.s32 0, %v59_v6  ;;  %v69_v8 = vsub.s32 1, %v59_v6  ;;  %v79_v11 = vsub.s32 2, %v59_v6  ;;  %v89_v13 = vsub.s32 3, %v59_v6  ;;  %p198_p10 = scmp.ne.s32.totalorder %s108_s20, %s197_s21  ;;  %p203_p12 = scmp.lt.s32.totalorder %s197_s21, %s197_s21 }
  0x3c   :  { %127 = vset.pattern.permute.xlu0 %v230_v3  ;;  %129 = vset.pattern.permute.xlu1 %v231_v4  ;;  %v61_v14 = vrot.slane %v51_v9, %v60_v7  ;;  %v70_v15 = vrot.slane %v51_v9, %v69_v8  ;;  %v80_v16 = vrot.slane %v51_v9, %v79_v11  ;;  %p204_p13 = por %p203_p12, %p202_p11 }
  0x3d   :  { %64 = vperm.xlu0 %127, %v50_v2   ;;  %84 = vperm.xlu1 %129, %v50_v2   ;;  %v90_v17 = vrot.slane %v51_v9, %v89_v13 }
  0x3e   :  { %p205_p0 = pnand %p204_p13, %p198_p10 }
  0x41   :  { %130 = vset.pattern.permute.xlu0 %v231_v4 }
  0xb7   :  { %v56_v10 = vpop.permute.xlu0 %55  ;;  %v75_v12 = vpop.permute.xlu1 %74 }
  0xb8   :  { %v62_v20 = vmul.f32 %v61_v14, %v56_v10  ;;  %v81_v22 = vmul.f32 %v80_v16, %v75_v12 }
  0xbc   :  { %v65_v18 = vpop.permute.xlu0 %64  ;;  %v85_v19 = vpop.permute.xlu1 %84 }
  0xbd   :  { %v71_v21 = vmul.f32 %v70_v15, %v65_v18  ;;  %v91_v24 = vmul.f32 %v90_v17, %v85_v19 }
  0xbf   :  { %v72_v23 = vadd.f32 %v71_v21, %v62_v20 }
  0xc1   :  { %v82_v25 = vadd.f32 %v81_v22, %v72_v23 }
  0xc3   :  { %v92_v27 = vadd.f32 %v91_v24, %v82_v25 }
  0xc5   :  { %v99_v28 = vadd.f32 %v117_v26, %v92_v27 }
  0xc7   :  { %100 = vst [vmem:[#allocation8] sm:$0xff] %v99_v28 }
  0xc8   :  { %208 = shalt.err (!%p205_p0)
}
  0xc9   :  { %s209_s24 = scalar_lea.hbm %s304_s3, 128 }
  0xca   :  { %p210_p1 = scmp.ne.s32.totalorder %s304_s3, %s209_s24  ;;  %p213_p2 = scmp.lt.u32.totalorder %s209_s24, %s304_s3 }
  0xcc   :  { %p215_p3 = pnand %p213_p2, %p210_p1 }
  0xce   :  { %218 = shalt.err (!%p215_p3)
}
  0xcf   :  { %110 = dma.vmem_to_hbm [thread:$0]  %s108_s20, 128, %s304_s3, [#allocation4]  }
  0xd0   :  { %223 = dma.done.wait [#allocation4], 128  }
  0xd1   :  { %224 = vsyncadd [#allocation4], 4294967168 }
  0xd2   :  { %114 = vsyncpa [#allocation3], 1 }
  0xd3   :  { %115 = vsyncpa [#allocation6], 1 }
  0xd4   :  { %116 = vsyncpa [#allocation4], 1 }

</bundles_post_ra>
